<compile_context>
chip_gen: v7x
topology: tpu7x:2x2x1
jax: 0.10.0
libtpu: 0.0.40
codegen_flags: <defaults>
</compile_context>

<pallas_src>
import jax
import jax.numpy as jnp
from jax.experimental import pallas as pl
from jax.experimental.pallas import tpu as pltpu


# ----------------------------- kernel -------------------------------------- #

def projector_kernel(x_ref, w_ref, b_ref, out_ref):
    # x_ref  : (Bb, Cin, THW)  current batch-block / spatial tile (pipelined)
    # w_ref  : (B, 1, Cin)     folded per-batch filters, whole array in VMEM
    # b_ref  : (B, 1, 1)       folded per-batch biases, whole array in VMEM
    # out_ref: (Bb, 1, THW)
    Bb = x_ref.shape[0]
    b0 = pl.program_id(0) * Bb
    if Bb > 1:
        b0 = pl.multiple_of(b0, Bb)
    w = w_ref[pl.ds(b0, Bb)]                       # (Bb, 1, Cin)
    bias = b_ref[pl.ds(b0, Bb)]                    # (Bb, 1, 1), f32
    # (Bb,1,Cin) x (Bb,Cin,THW) -> (Bb,1,THW); HW stays the lane axis.
    acc = jnp.einsum('bic,bct->bit', w, x_ref[...],
                     preferred_element_type=jnp.float32)
    out_ref[...] = (acc + bias).astype(out_ref.dtype)


# ----------------------------- tiling helpers ------------------------------ #

def _round_down(x, m):
    return (x // m) * m


def _largest_divisor_leq(n, cap):
    cap = int(max(1, min(n, cap)))
    for d in range(cap, 0, -1):
        if n % d == 0:
            return d
    return 1


def _tile_budget_bytes():
    # HBM-bound kernel: size the x tile from a byte budget. ~8 MiB when the
    # chip has 128 MiB physical VMEM (v5e/v6e), ~4 MiB on v7x (64 MiB per TC).
    # Double-buffered this stays well inside the 48 MiB scoped-VMEM limit set
    # below on every generation.
    try:
        cap = getattr(pltpu.get_tpu_info(), "vmem_capacity_bytes", 64 << 20)
    except Exception:  # pragma: no cover - be robust to API drift
        cap = 64 << 20
    return (8 << 20) if cap >= (128 << 20) else (4 << 20)


# ----------------------------- wrapper -------------------------------------- #

def projector_forward(x_nchw, word, w_vis, b_vis, w_txt, b_txt):
    """x_nchw: (B, Cin, H, W); word: (B, Wd). Returns (B, 1, H, W) float32."""
    B, Cin, H, W = x_nchw.shape
    HW = H * W
    Ch = w_vis.shape[0]  # hidden_dim

    # Tiny per-batch math hoisted to plain JAX (txt linear + exact weight fold).
    t = word @ w_txt.T + b_txt                            # (B, Ch+1)
    w_dyn = t[:, :Ch]                                     # (B, Ch)
    b_dyn = t[:, Ch]                                      # (B,)
    w_vis2 = w_vis.reshape(Ch, Cin)                       # (Ch, Cin)
    w_comb = (w_dyn @ w_vis2).reshape(B, 1, Cin).astype(x_nchw.dtype)
    b_comb = (w_dyn @ b_vis + b_dyn).reshape(B, 1, 1).astype(jnp.float32)

    # Free layout change: keep NCHW, flatten spatial so HW is the lane axis.
    x = x_nchw.reshape(B, Cin, HW)
    itemsize = jnp.dtype(x.dtype).itemsize

    # --- byte-budget tile selection ---
    tile_budget = _tile_budget_bytes()
    per_batch_bytes = Cin * HW * itemsize
    if per_batch_bytes <= tile_budget:
        # Whole spatial extent per step; pack several batches per grid step to
        # amortize the fixed per-step overhead on small feature maps.
        THW = HW
        Bb = _largest_divisor_leq(B, tile_budget // max(per_batch_bytes, 1))
    else:
        Bb = 1
        lanes = _round_down(tile_budget // (Cin * itemsize), 128)
        THW = max(512, lanes)          # lane-dense, multiple of 128
        if THW >= HW:
            THW = HW                   # full-extent block is always legal

    # v7x megacore: guarantee >= 2 independent grid steps when possible.
    if (B // Bb) * pl.cdiv(HW, THW) < 2:
        if B > 1:
            Bb = _largest_divisor_leq(B, B // 2)
        elif HW > 128:
            THW = max(128, _round_down(pl.cdiv(HW, 2), 128))

    grid = (B // Bb, pl.cdiv(HW, THW))

    cost = pl.CostEstimate(
        flops=2 * B * Cin * HW,
        bytes_accessed=(itemsize * B * Cin * HW   # x read
                        + 4 * B * HW              # out write (f32)
                        + itemsize * B * Cin      # folded weights
                        + 4 * B),                 # folded biases
        transcendentals=0,
    )

    out = pl.pallas_call(
        projector_kernel,
        out_shape=jax.ShapeDtypeStruct((B, 1, HW), jnp.float32),
        grid_spec=pltpu.PrefetchScalarGridSpec(
            num_scalar_prefetch=0,
            grid=grid,
            in_specs=[
                pl.BlockSpec((Bb, Cin, THW), lambda bi, ti: (bi, 0, ti)),
                pl.BlockSpec(memory_space=pltpu.MemorySpace.VMEM),  # w_comb
                pl.BlockSpec(memory_space=pltpu.MemorySpace.VMEM),  # b_comb
            ],
            out_specs=pl.BlockSpec((Bb, 1, THW), lambda bi, ti: (bi, 0, ti)),
        ),
        compiler_params=pltpu.CompilerParams(
            dimension_semantics=("parallel", "parallel"),
            vmem_limit_bytes=48 * 1024 * 1024,
        ),
        cost_estimate=cost,
    )(x, w_comb, b_comb)

    return out.reshape(B, 1, H, W)


# ----------------------------- reference ------------------------------------ #

def projector_reference(x_nchw, word, w_vis, b_vis, w_txt, b_txt):
    Ch = w_vis.shape[0]
    v = jnp.einsum('bchw,oc->bohw', x_nchw, w_vis.reshape(Ch, -1))
    v = v + b_vis[None, :, None, None]
    t = word @ w_txt.T + b_txt
    w_dyn, b_dyn = t[:, :-1], t[:, -1]
    out = jnp.einsum('bchw,bc->bhw', v, w_dyn) + b_dyn[:, None, None]
    return out[:, None, :, :]


if __name__ == "__main__":
    # small shapes consistent with the module (kernel_size = 1)
    B, in_dim, hidden_dim, word_dim = 2, 32, 16, 32
    H = W = 16
    out_dim = hidden_dim + 1

    key = jax.random.PRNGKey(0)
    kx, kw, k1, k2, k3, k4 = jax.random.split(key, 6)

    x = jax.random.normal(kx, (B, in_dim, H, W), dtype=jnp.float32)
    word = jax.random.normal(kw, (B, word_dim), dtype=jnp.float32)

    # deterministic parameter init (synthetic, not a checkpoint)
    w_vis = 0.05 * jax.random.normal(k1, (hidden_dim, in_dim), dtype=jnp.float32)
    b_vis = 0.05 * jax.random.normal(k2, (hidden_dim,), dtype=jnp.float32)
    w_txt = 0.05 * jax.random.normal(k3, (out_dim, word_dim), dtype=jnp.float32)
    b_txt = 0.05 * jax.random.normal(k4, (out_dim,), dtype=jnp.float32)

    out = projector_forward(x, word, w_vis, b_vis, w_txt, b_txt)
    out = jax.block_until_ready(out)

    ref = projector_reference(x, word, w_vis, b_vis, w_txt, b_txt)
    assert out.shape == (B, 1, H, W), out.shape
    # NOTE: the exact weight fold reorders the Cin->Ch reduction vs PyTorch;
    # expected f32 deviation ~1e-6..1e-5, well inside this tolerance.
    assert jnp.allclose(out, ref, atol=1e-4, rtol=1e-4), \
        float(jnp.max(jnp.abs(out - ref)))

    print("KERNEL_OK")
</pallas_src>

<mosaic_0001>
module attributes {stable_mosaic.version = 11 : i64} {
  func.func @projector_kernel(%arg0: i32, %arg1: i32, %arg2: memref<1x32x256xf32, #tpu.memory_space<vmem>>, %arg3: memref<2x1x32xf32, #tpu.memory_space<vmem>>, %arg4: memref<2x1x1xf32, #tpu.memory_space<vmem>>, %arg5: memref<1x1x256xf32, #tpu.memory_space<vmem>>) attributes {dimension_semantics = [#tpu.dimension_semantics<parallel>, #tpu.dimension_semantics<parallel>], iteration_bounds = array<i64: 2, 1>, scalar_prefetch = 0 : i64, scratch_operands = 0 : i64, tpu.core_type = #tpu.core_type<tc>, window_params = [{transform_indices = @transform_0, window_bounds = array<i64: 1, 32, 256>}, {pipeline_mode = #tpu.pipeline_mode<synchronous>, transform_indices = @transform_1, window_bounds = array<i64: 2, 1, 32>}, {pipeline_mode = #tpu.pipeline_mode<synchronous>, transform_indices = @transform_2, window_bounds = array<i64: 2, 1, 1>}, {transform_indices = @transform_3, window_bounds = array<i64: 1, 1, 256>}]} {
    %c1_i32 = arith.constant 1 : i32
    %0 = arith.muli %arg0, %c1_i32 : i32
    %1 = arith.index_cast %0 : i32 to index
    %c0 = arith.constant 0 : index
    %c0_0 = arith.constant 0 : index
    %2 = vector.load %arg3[%1, %c0, %c0_0] : memref<2x1x32xf32, #tpu.memory_space<vmem>>, vector<1x1x32xf32>
    %3 = arith.index_cast %0 : i32 to index
    %c0_1 = arith.constant 0 : index
    %c0_2 = arith.constant 0 : index
    %4 = vector.load %arg4[%3, %c0_1, %c0_2] : memref<2x1x1xf32, #tpu.memory_space<vmem>>, vector<1x1x1xf32>
    %c0_3 = arith.constant 0 : index
    %c0_4 = arith.constant 0 : index
    %c0_5 = arith.constant 0 : index
    %5 = vector.load %arg2[%c0_3, %c0_4, %c0_5] : memref<1x32x256xf32, #tpu.memory_space<vmem>>, vector<1x32x256xf32>
    "tpu.trace_start"() <{level = 10 : i32, message = "bic,bct->bit"}> : () -> ()
    %cst = arith.constant dense<0.000000e+00> : vector<1x1x256xf32>
    %6 = tpu.matmul %2, %5, %cst {dimension_numbers = #tpu.dot_dimension_numbers<[2], [1], [1], [2], [0, 0, 0, 1, 1, 2], [0], [0]>} : vector<1x1x32xf32>, vector<1x32x256xf32>, vector<1x1x256xf32> -> vector<1x1x256xf32>
    "tpu.trace_stop"() : () -> ()
    %7 = vector.broadcast %4 : vector<1x1x1xf32> to vector<1x1x256xf32>
    %8 = arith.addf %6, %7 : vector<1x1x256xf32>
    %c0_6 = arith.constant 0 : index
    %c0_7 = arith.constant 0 : index
    %c0_8 = arith.constant 0 : index
    %9 = vector.load %arg5[%c0_6, %c0_7, %c0_8] : memref<1x1x256xf32, #tpu.memory_space<vmem>>, vector<1x1x256xf32>
    tpu.vector_store %arg5[%c0_6, %c0_7, %c0_8], %8 {strides = array<i32>} : memref<1x1x256xf32, #tpu.memory_space<vmem>>, vector<1x1x256xf32>,
    return
  }
  func.func @transform_0(%arg0: i32, %arg1: i32) -> (i32, i32, i32) {
    %c0_i32 = arith.constant 0 : i32
    %c0_i32_0 = arith.constant 0 : i32
    return %arg0, %c0_i32, %arg1 : i32, i32, i32
  }
  func.func @transform_1(%arg0: i32, %arg1: i32) -> (i32, i32, i32) {
    %c0_i32 = arith.constant 0 : i32
    %c0_i32_0 = arith.constant 0 : i32
    %c0_i32_1 = arith.constant 0 : i32
    %c0_i32_2 = arith.constant 0 : i32
    return %c0_i32, %c0_i32_0, %c0_i32_1 : i32, i32, i32
  }
  func.func @transform_2(%arg0: i32, %arg1: i32) -> (i32, i32, i32) {
    %c0_i32 = arith.constant 0 : i32
    %c0_i32_0 = arith.constant 0 : i32
    %c0_i32_1 = arith.constant 0 : i32
    %c0_i32_2 = arith.constant 0 : i32
    return %c0_i32, %c0_i32_0, %c0_i32_1 : i32, i32, i32
  }
  func.func @transform_3(%arg0: i32, %arg1: i32) -> (i32, i32, i32) {
    %c0_i32 = arith.constant 0 : i32
    %c0_i32_0 = arith.constant 0 : i32
    return %arg0, %c0_i32, %arg1 : i32, i32, i32
  }
}

</mosaic_0001>

<bundles_post_ra>
// kernel: tpu_custom_call.1
= control target key start
LH: loop header
LB: loop body
LE: loop exit
PB: predicated region body
PF: predicated region fallthrough
CT: control target
= control target key end

     0   :  { %8 = vsyncpa [#allocation3], 0  ;;  %s848_s0 = inlined_call_operand.hbm [shape: f32[2,32,256], index: 0, kind: input, shape index: {}]   ;;  %s849_s1 = inlined_call_operand.vmem [shape: f32[2,1,32], index: 1, kind: input, shape index: {}]   ;;  %s850_s2 = inlined_call_operand.vmem [shape: f32[2,1,1], index: 2, kind: input, shape index: {}]   ;;  %s851_s3 = inlined_call_operand.hbm [shape: f32[2,1,256], index: 3, kind: output, shape index: {}]  }
   0x1   :  { %10 = vsyncpa [#allocation3 + $0x1], 0 }
   0x2   :  { %11 = vsyncpa [#allocation4], 0 }
   0x3   :  { %13 = vsyncpa [#allocation4 + $0x1], 0  ;;  %s666_s12 = smov 0   ;;  %s668_s13 = smov 0  }
   0x4   :  { %s670_s14 = smov 0   ;;  %s672_s15 = smov 0  }
   0x5   :  { %s674_s16 = smov 0   ;;  %s676_s17 = smov 0  }
   0x6 LB: > { %s431_s18 = sadd.s32 4294967295, %s637_s17   ;;  %s432_s19 = sadd.s32 4294967294, %s637_s17   ;;  %s637_s17 = sphi %s676_s17, %s19_s17   ;;  %s633_s16 = sphi %s674_s16, %s866_s16   ;;  %s629_s15 = sphi %s672_s15, %s865_s15   ;;  %s625_s14 = sphi %s670_s14, %s864_s14   ;;  %s621_s13 = sphi %s668_s13, %s863_s13   ;;  %s617_s12 = sphi %s666_s12, %s862_s12  }
   0x7   : > { %s31_s20 = sadd.s32 1, %s633_s16  ;;  %s40_s21 = sadd.s32 1, %s625_s14 }
   0x8   : > { %p33_p0 = scmp.ge.s32.totalorder %s31_s20, 2  ;;  %p47_p1 = scmp.ne.s32.totalorder %s625_s14, %s621_s13 }
   0x9   : > { %p48_p2 = scmp.eq.s32.totalorder %s637_s17, 0  ;;  %p53_p3 = scmp.ne.s32.totalorder %s621_s13, %s617_s12 }
   0xa   : > { %s868_s20 = smov (%p33_p0, %s31_s20), 0  ;;  %p54_p5 = scmp.eq.s32.totalorder %s431_s18, 0 }
   0xb   : > { %p707_p4 = por %p48_p2, %p47_p1  ;;  %s35_s23 = ssub.s32 %s633_s16, %s868_s20 }
   0xc   : > { %p121_p6 = scmp.eq.s32.totalorder %s431_s18, 1  ;;  %p38_p7 = scmp.eq.s32.totalorder %s35_s23, 0 }
   0xd   : > { %p713_p8 = por %p54_p5, %p53_p3  ;;  %p127_p10 = scmp.eq.s32.totalorder %s432_s19, 1 }
   0xe   : > { %p717_p9 = por %p121_p6, %p47_p1  ;;  %p469_p13 = scmp.lt.s32.totalorder %s637_s17, 2 }
   0xf   : > { %s722_s26 = scalar_select %p38_p7, %s625_s14, %s40_s21  }
  0x10   : > { %s855_s25 = scalar_select %p717_p9, 1, 0 }
  0x11   : > { %p724_p11 = por %p127_p10, %p53_p3  ;;  %s153_s28 = sand.u32 1, %s625_s14  }
  0x12   : > { %s435_s29 = sshll.u32 %s153_s28, 6  ;;  %s447_s30 = sshll.u32 %s633_s16, 10 }
  0x13   : > { %s856_s27 = scalar_select %p724_p11, 1, 0 }
  0x14   : > { %s735_s6 = scalar_lea.hbm %s848_s0, %s447_s30  ;;  %s157_s7 = scalar_lea.vmem [#allocation2], %s435_s29 }
  0x15   : > { %s166_s8 = sshll.u32 %s157_s7, 4  ;;  %p741_p0 = pnand %p469_p13, %p707_p4  ;;  %s737_s8 = int_to_ptr.vmem [resolvable:$true] %s166_s8 }
  0x16   : > { %s746_s10 = scalar_lea.sflag [#allocation3], %s153_s28  ;;  %s525_s11 = scalar_lea.hbm %s735_s6, 1024 }
  0x17   : > { %p526_p2 = scmp.ne.s32.totalorder %s735_s6, %s525_s11  ;;  %p527_p3 = pneg %p741_p0 }
  0x18   : > { %s530_s21 = scalar_lea.hbm %s848_s0, 2048  ;;  %p531_p4 = scmp.lt.u32.totalorder %s735_s6, %s848_s0 }
  0x19   : > { %p528_p5 = pnand %p527_p3, %p526_p2  ;;  %p532_p7 = scmp.lt.u32.totalorder %s530_s21, %s525_s11 }
  0x1a   : > { %p534_p13 = scmp.lt.u32.totalorder %s525_s11, %s735_s6 }
  0x1b   : > { %p529_p6 = pneg %p528_p5  ;;  %p533_p10 = por %p532_p7, %p531_p4 }
  0x1d   : > { %p535_p12 = por %p534_p13, %p533_p10 }
  0x1f   : > { %p536_p1 = pnand %p535_p12, %p529_p6 }
  0x21   : > { %539 = shalt.err (!%p536_p1)
}
  0x22   : > { %s540_s28 = scalar_lea.vmem %s737_s8, 1024  ;;  %s639_s29 = smov [#allocation2]  }
  0x23   : > { %p541_p2 = scmp.ne.s32.totalorder %s737_s8, %s540_s28  ;;  %s545_s30 = sshll.u32 %s639_s29, 4  ;;  %s546_s30 = int_to_ptr.vmem [resolvable:$false] %s545_s30 }
  0x24   : > { %s547_s4 = scalar_lea.vmem %s546_s30, 2048  ;;  %p548_p9 = scmp.lt.s32.totalorder %s737_s8, %s546_s30 }
  0x25   : > { %p543_p5 = pnand %p541_p2, %p527_p3  ;;  %p549_p4 = scmp.lt.s32.totalorder %s547_s4, %s540_s28 }
  0x27   : > { %p544_p11 = pneg %p543_p5  ;;  %p550_p7 = por %p549_p4, %p548_p9 }
  0x29   : > { %p551_p10 = pnand %p550_p7, %p544_p11 }
  0x2b   : > { %554 = shalt.err (!%p551_p10)
}
  0x2c   : > { %s640_s5 = smov 256   ;;  %s641_s7 = smov 16  }
  0x2d   : > { %464 = dma.hbm_to_vmem [thread:$0]  (!%p741_p0), %s735_s6, 1024, %s737_s8, %s746_s10, %s640_s5, %s640_s5, %s641_s7  }
  0x2e   : > { %p174_p12 = scmp.lt.s32.totalorder %s637_s17, 3  ;;  %p858_p1 = scmp.ge.s32.totalorder %s637_s17, 1 }
  0x30   : > { %p175_p3 = pnand %p858_p1, %p174_p12 }
  0x31   : > { %s778_s11 = sand.u32 (!%p175_p3), 1, %s621_s13  }
  0x32   : > { %178 = sbr.rel (%p175_p3) target bundleno = 304 (0x130), region = 32  ;;  %s439_s18 = sshll.u32 (!%p175_p3), %s778_s11, 6 }
  0x33   : > { %s181_s19 = scalar_lea.sflag (!%p175_p3), [#allocation3], %s778_s11  ;;  %s184_s21 = scalar_lea.vmem (!%p175_p3), [#allocation2], %s439_s18 }
  0x39   : > { %608 = dma.done.wait (%p713_p8), %s181_s19, 1024  }
  0x3a   : > { %610 = vsyncadd (%p713_p8), %s181_s19, 4294966272  ;;  %v642_v0 = vmov 0.0   ;;  %v643_v1 = vmov 0   ;;  %v214_v2 = vld [vmem:[%s184_s21 + $0x8] sm:$0xff]  ;;  %v216_v3 = vld [vmem:[%s184_s21 + $0x18] sm:$0xff]  ;;  %s211_s9 = scalar_lea.vmem %s850_s2, %s629_s15  ;;  %s209_s22 = scalar_lea.vmem %s849_s1, %s629_s15  ;;  %vm230_vm0 = vcmask 261120   ;;  %v226_v16 = vlaneseq }
  0x3b   : > { %298 = vmatprep.mubr.f32.mxu0 %v642_v0  ;;  %524 = vset.pattern.permute.xlu0 %v643_v1  ;;  %v213_v4 = vld [vmem:[%s184_s21] sm:$0xff]  ;;  %v449_v5 = vpack.c.bf16 %v216_v3, %v214_v2  ;;  %v215_v6 = vld [vmem:[%s184_s21 + $0x10] sm:$0xff]  ;;  %v218_v7 = vld [vmem:[%s184_s21 + $0x28] sm:$0xff]  ;;  %v644_v20 = vmov 1966171168   ;;  %s440_s23 = sshll.u32 %s778_s11, 1 }
  0x3c   : > { %v220_v8 = vld [vmem:[%s184_s21 + $0x38] sm:$0xff]  ;;  %v451_v9 = vpack.c.bf16 %v215_v6, %v213_v4  ;;  %v217_v11 = vld [vmem:[%s184_s21 + $0x20] sm:$0xff]  ;;  %v219_v12 = vld [vmem:[%s184_s21 + $0x30] sm:$0xff]  ;;  %v227_v17 = vshrl.u32 %v226_v16, 7  ;;  %v309_v21 = vunpack.c.l.s4 %v644_v20  ;;  %s448_s28 = sshll.u32 %s629_s15, 5  ;;  %s206_s29 = scalar_lea.vmem [#allocation5], %s440_s23 }
  0x3d   : > { %v453_v10 = vpack.c.bf16 %v220_v8, %v218_v7  ;;  %450 = vmatprep.subr.bf16.mxu0 %v449_v5  ;;  %v212_v13 = vld [vmem:[%s211_s9] sm:$0x1]  ;;  %v455_v14 = vpack.c.bf16 %v219_v12, %v217_v11  ;;  %s345_s30 = sshll.u32 %s206_s29, 4  ;;  %vm325_vm1 = vcmp.lt.s32.totalorder %v226_v16, 256  ;;  %s799_s7 = scalar_lea.hbm %s851_s3, %s448_s28  ;;  %s801_s30 = int_to_ptr.vmem [resolvable:$true] %s345_s30 }
  0x3e   : > { %452 = vmatpush1.bf16.msra.mxu0 %v451_v9  ;;  %223 = vperm.xlu0 %524, %v212_v13   ;;  %v210_v15 = vld [vmem:[%s209_s22] sm:$0x1]  ;;  %v228_v18 = vsub.s32 0, %v227_v17  ;;  %v310_v23 = vunpack.c.0.s8 %v309_v21  ;;  %s329_s18 = scalar_lea.sflag [#allocation4], %s778_s11  ;;  %s555_s19 = scalar_lea.vmem %s801_s30, 32 }
  0x3f   : > { %454 = vmatprep.subr.bf16.mxu0 %v453_v10  ;;  %p556_p8 = scmp.ne.s32.totalorder %s801_s30, %s555_s19  ;;  %p859_p9 = scmp.ne.s32.totalorder %s855_s25, 0 }
  0x40   : > { %v313_v28 = vsub.s32 %v310_v23, %v227_v17  ;;  %s645_s15 = smov [#allocation5]  }
  0x41   : > { %p557_p11 = pnand %p556_p8, %p859_p9  ;;  %s559_s21 = sshll.u32 %s645_s15, 4  ;;  %s560_s21 = int_to_ptr.vmem [resolvable:$false] %s559_s21 }
  0x42   : > { %456 = vmatpush1.bf16.msra.mxu0 %v455_v14  ;;  %s561_s6 = scalar_lea.vmem %s560_s21, 64  ;;  %p562_p6 = scmp.lt.s32.totalorder %s801_s30, %s560_s21 }
  0x43   : > { %p558_p0 = pneg %p557_p11  ;;  %p563_p13 = scmp.lt.s32.totalorder %s561_s6, %s555_s19 }
  0x45   : > { %441 = vmatmul.mubr.msk.f32.vlgmr.msra.gmra.mrb[0].mxu0 %vm230_vm0, %v210_v15  ;;  %p564_p2 = por %p563_p13, %p562_p6 }
  0x47   : > { %p565_p5 = pnand %p564_p2, %p558_p0 }
  0xbd   : > { %v224_v19 = vpop.permute.xlu0 %223 }
  0xbe   : > { %v229_v22 = vrot.slane %v224_v19, %v228_v18 }
 0x118   : > { %v300_v24 = vpop.f32.mrb[0].mxu0 }
 0x119   : > { %v301_v25 = vadd.f32 %v300_v24, %v229_v22  ;;  %v302_v26 = vpop.f32.mrb[1].mxu0 }
 0x11a   : > { %v303_v27 = vadd.f32 %v302_v26, %v229_v22 }
 0x11c   : > { %v307_v29 = vcombine.low %v301_v25, %v303_v27 }
 0x11e   : > { %v314_v30 = vrot.slane %v307_v29, %v313_v28 }
 0x120   : > { %v321_v31 = vrot.slane %v314_v30, %v313_v28 }
 0x122   : > { %327 = vst.msk [vmem:[%s206_s29] sm:$0x3] %vm325_vm1, %v321_v31 }
 0x123   : > { %568 = shalt.err (!%p565_p5)
}
 0x124   : > { %s569_s11 = scalar_lea.hbm %s799_s7, 32  ;;  %s573_s24 = scalar_lea.hbm %s851_s3, 64 }
 0x125   : > { %p570_p4 = scmp.ne.s32.totalorder %s799_s7, %s569_s11  ;;  %p574_p12 = scmp.lt.u32.totalorder %s799_s7, %s851_s3 }
 0x126   : > { %p575_p1 = scmp.lt.u32.totalorder %s573_s24, %s569_s11  ;;  %p577_p8 = scmp.lt.u32.totalorder %s569_s11, %s799_s7 }
 0x127   : > { %p571_p7 = pnand %p570_p4, %p859_p9 }
 0x128   : > { %p576_p3 = por %p575_p1, %p574_p12 }
 0x129   : > { %p572_p10 = pneg %p571_p7 }
 0x12a   : > { %p578_p11 = por %p577_p8, %p576_p3 }
 0x12c   : > { %p579_p0 = pnand %p578_p11, %p572_p10 }
 0x12e   : > { %582 = shalt.err (!%p579_p0)
}
 0x12f   : > { %459 = dma.vmem_to_hbm [thread:$0]  (%p859_p9), %s801_s30, 32, %s799_s7, %s329_s18  }
 0x130 PF: > { %s357_s23 = sand.u32 1, %s617_s12   ;;  %p860_p6 = scmp.ne.s32.totalorder %s856_s27, 0 }
 0x131   : > { %p861_p13 = scmp.ge.s32.totalorder %s637_s17, 2  ;;  %s358_s28 = scalar_lea.sflag [#allocation4], %s357_s23 }
 0x133   : > { %p466_p2 = pnand %p861_p13, %p860_p6 }
 0x135   : > { %612 = dma.done.wait (!%p466_p2), %s358_s28, 32  }
 0x136   : > { %614 = vsyncadd (!%p466_p2), %s358_s28, 4294967264  ;;  %s19_s17 = sadd.s32 1, %s637_s17   ;;  %s862_s12 = smov %s621_s13 }
 0x137   : > { %p16_p5 = scmp.ge.s32.totalorder %s19_s17, 4   ;;  %s863_s13 = smov %s625_s14 }
 0x138   : > { %s864_s14 = smov %s722_s26  ;;  %s865_s15 = smov %s633_s16 }
 0x139   : > { %s866_s16 = smov %s868_s20  ;;  %18 = sbr.rel (!%p16_p5) target bundleno = 6 (0x6), region = 79 }
 0x140   :  { %363 = vsyncpa [#allocation3], 1 }
 0x141   :  { %365 = vsyncpa [#allocation3 + $0x1], 1 }
 0x142   :  { %366 = vsyncpa [#allocation4], 1 }
 0x143   :  { %368 = vsyncpa [#allocation4 + $0x1], 1 }

</bundles_post_ra>
